<compile_context>
chip_gen: v7x
topology: tpu7x:2x2x1
jax: 0.10.0
libtpu: 0.0.40
codegen_flags: <defaults>
</compile_context>

<pallas_src>
import jax
import jax.numpy as jnp
from jax.experimental import pallas as pl
from jax.experimental.pallas import tpu as pltpu


def _value_net_kernel(xt_ref, w1_ref, b1_ref, w2_ref, b2_ref, o_ref):
    # Layer 1 on the MXU, batch along lanes: (32, in) @ (in, TB) -> (32, TB)
    h = jnp.dot(w1_ref[...], xt_ref[...], preferred_element_type=jnp.float32)
    h = jnp.maximum(h + b1_ref[...], 0.0)                  # bias + ReLU on VPU
    # Layer 2 (32 -> 1): VPU multiply by w2 column + sublane (XLU) reduce.
    y = jnp.sum(h * w2_ref[...], axis=0, keepdims=True)    # (1, TB), lane-dense
    o_ref[...] = y + b2_ref[0]                             # scalar bias (SMEM)


def value_network_forward(obs, w1, b1, w2, b2, *, block_b=512):
    """Forward pass of Value_Network.

    obs : (B, input_size) float32
    w1  : (32, input_size)   -- torch layer_1.weight layout
    b1  : (32,)
    w2  : (1, 32)            -- torch layer_2.weight layout (output_size == 1)
    b2  : (1,)
    returns (B, 1) float32
    """
    if w2.shape[0] != 1:
        # TODO(synk): output_size > 1 would reinstate a second MXU matmul; the
        # VPG value network is always scalar-valued, so we specialize to it.
        raise NotImplementedError("kernel is specialized to output_size == 1")

    B, in_size = obs.shape
    hidden = w1.shape[0]

    # Batch tile: lane axis must be a multiple of 128; adapt to small batches.
    tb = min(block_b, max(128, pl.cdiv(B, 128) * 128))
    nb = pl.cdiv(B, tb)
    bp = nb * tb

    # Lane-dense layout: batch along lanes, features along sublanes.
    xt = obs.T                                    # (in, B)
    if bp != B:
        xt = jnp.pad(xt, ((0, 0), (0, bp - B)))
    b1c = b1.reshape(hidden, 1)                   # column bias for layer 1
    w2c = w2.reshape(hidden, 1)                   # column form of layer-2 weight
    b2s = b2.reshape(1)                           # scalar bias -> SMEM

    out = pl.pallas_call(
        _value_net_kernel,
        out_shape=jax.ShapeDtypeStruct((1, bp), jnp.float32),
        grid=(nb,),
        in_specs=[
            pl.BlockSpec((in_size, tb), lambda i: (0, i)),       # x^T batch tile
            pl.BlockSpec((hidden, in_size), lambda i: (0, 0)),   # w1 (resident)
            pl.BlockSpec((hidden, 1), lambda i: (0, 0)),         # b1 (resident)
            pl.BlockSpec((hidden, 1), lambda i: (0, 0)),         # w2 (resident)
            pl.BlockSpec(memory_space=pltpu.MemorySpace.SMEM),   # b2 scalar
        ],
        out_specs=pl.BlockSpec((1, tb), lambda i: (0, i)),
        compiler_params=pltpu.CompilerParams(
            dimension_semantics=("parallel",)),
    )(xt, w1, b1c, w2c, b2s)

    return out[0, :B].reshape(B, 1)


def init_params(key, input_size, hidden_size, output_size):
    """torch.nn.Linear default init (U[-1/sqrt(fan_in), +]), torch weight layout."""
    k1, k2, k3, k4 = jax.random.split(key, 4)
    bound1 = 1.0 / jnp.sqrt(jnp.float32(input_size))
    bound2 = 1.0 / jnp.sqrt(jnp.float32(hidden_size))
    w1 = jax.random.uniform(k1, (hidden_size, input_size), jnp.float32,
                            -bound1, bound1)
    b1 = jax.random.uniform(k2, (hidden_size,), jnp.float32, -bound1, bound1)
    w2 = jax.random.uniform(k3, (output_size, hidden_size), jnp.float32,
                            -bound2, bound2)
    b2 = jax.random.uniform(k4, (output_size,), jnp.float32, -bound2, bound2)
    return w1, b1, w2, b2


if __name__ == "__main__":
    key = jax.random.PRNGKey(0)
    k_params, k_obs = jax.random.split(key)

    input_size = 4       # e.g. CartPole observation dim
    hidden_size = 32     # fixed in the module
    output_size = 1      # scalar state value
    batch = 600          # exercises the grid (tb=512 -> 2 tiles) + lane padding

    w1, b1, w2, b2 = init_params(k_params, input_size, hidden_size, output_size)
    obs = jax.random.normal(k_obs, (batch, input_size), jnp.float32)

    out = value_network_forward(obs, w1, b1, w2, b2)
    out = jax.block_until_ready(out)

    # Reference in plain JAX (torch semantics: relu(x @ W1^T + b1) @ W2^T + b2)
    ref = jnp.maximum(obs @ w1.T + b1, 0.0) @ w2.T + b2
    assert out.shape == (batch, output_size)
    assert jnp.allclose(out, ref, atol=1e-4, rtol=1e-4)

    print("KERNEL_OK")
</pallas_src>

<mosaic_0001>
module attributes {stable_mosaic.version = 11 : i64} {
  func.func @_value_net_kernel(%arg0: i32, %arg1: memref<4x512xf32, #tpu.memory_space<vmem>>, %arg2: memref<32x4xf32, #tpu.memory_space<vmem>>, %arg3: memref<32x1xf32, #tpu.memory_space<vmem>>, %arg4: memref<32x1xf32, #tpu.memory_space<vmem>>, %arg5: memref<1xf32, #tpu.memory_space<smem>>, %arg6: memref<1x512xf32, #tpu.memory_space<vmem>>) attributes {dimension_semantics = [#tpu.dimension_semantics<parallel>], iteration_bounds = array<i64: 2>, scalar_prefetch = 0 : i64, scratch_operands = 0 : i64, tpu.core_type = #tpu.core_type<tc>, window_params = [{transform_indices = @transform_0, window_bounds = array<i64: 4, 512>}, {pipeline_mode = #tpu.pipeline_mode<synchronous>, transform_indices = @transform_1, window_bounds = array<i64: 32, 4>}, {pipeline_mode = #tpu.pipeline_mode<synchronous>, transform_indices = @transform_2, window_bounds = array<i64: 32, 1>}, {pipeline_mode = #tpu.pipeline_mode<synchronous>, transform_indices = @transform_3, window_bounds = array<i64: 32, 1>}, {transform_indices = @transform_4, window_bounds = array<i64: 1>}, {transform_indices = @transform_5, window_bounds = array<i64: 1, 512>}]} {
    %c0 = arith.constant 0 : index
    %c0_0 = arith.constant 0 : index
    %0 = vector.load %arg2[%c0, %c0_0] : memref<32x4xf32, #tpu.memory_space<vmem>>, vector<32x4xf32>
    %c0_1 = arith.constant 0 : index
    %c0_2 = arith.constant 0 : index
    %1 = vector.load %arg1[%c0_1, %c0_2] : memref<4x512xf32, #tpu.memory_space<vmem>>, vector<4x512xf32>
    %cst = arith.constant dense<0.000000e+00> : vector<32x512xf32>
    %2 = tpu.matmul %0, %1, %cst {dimension_numbers = #tpu.dot_dimension_numbers<[1], [0], [0], [1], [0, 0, 1, 1], [], []>} : vector<32x4xf32>, vector<4x512xf32>, vector<32x512xf32> -> vector<32x512xf32>
    %c0_3 = arith.constant 0 : index
    %c0_4 = arith.constant 0 : index
    %3 = vector.load %arg3[%c0_3, %c0_4] : memref<32x1xf32, #tpu.memory_space<vmem>>, vector<32x1xf32>
    %4 = vector.broadcast %3 : vector<32x1xf32> to vector<32x512xf32>
    %5 = arith.addf %2, %4 : vector<32x512xf32>
    %cst_5 = arith.constant 0.000000e+00 : f32
    %6 = vector.broadcast %cst_5 : f32 to vector<32x512xf32>
    %7 = arith.maximumf %5, %6 : vector<32x512xf32>
    %c0_6 = arith.constant 0 : index
    %c0_7 = arith.constant 0 : index
    %8 = vector.load %arg4[%c0_6, %c0_7] : memref<32x1xf32, #tpu.memory_space<vmem>>, vector<32x1xf32>
    %9 = vector.broadcast %8 : vector<32x1xf32> to vector<32x512xf32>
    %10 = arith.mulf %7, %9 : vector<32x512xf32>
    %cst_8 = arith.constant dense<0.000000e+00> : vector<512xf32>
    %11 = vector.multi_reduction <add>, %10, %cst_8 [0] : vector<32x512xf32> to vector<512xf32>
    %12 = vector.shape_cast %11 : vector<512xf32> to vector<1x512xf32>
    %c0_9 = arith.constant 0 : index
    %13 = memref.load %arg5[%c0_9] : memref<1xf32, #tpu.memory_space<smem>>
    %14 = vector.broadcast %13 : f32 to vector<1x512xf32>
    %15 = arith.addf %12, %14 : vector<1x512xf32>
    %c0_10 = arith.constant 0 : index
    %c0_11 = arith.constant 0 : index
    %16 = vector.load %arg6[%c0_10, %c0_11] : memref<1x512xf32, #tpu.memory_space<vmem>>, vector<1x512xf32>
    tpu.vector_store %arg6[%c0_10, %c0_11], %15 {strides = array<i32>} : memref<1x512xf32, #tpu.memory_space<vmem>>, vector<1x512xf32>,
    return
  }
  func.func @transform_0(%arg0: i32) -> (i32, i32) {
    %c0_i32 = arith.constant 0 : i32
    %c0_i32_0 = arith.constant 0 : i32
    return %c0_i32, %arg0 : i32, i32
  }
  func.func @transform_1(%arg0: i32) -> (i32, i32) {
    %c0_i32 = arith.constant 0 : i32
    %c0_i32_0 = arith.constant 0 : i32
    %c0_i32_1 = arith.constant 0 : i32
    return %c0_i32, %c0_i32_0 : i32, i32
  }
  func.func @transform_2(%arg0: i32) -> (i32, i32) {
    %c0_i32 = arith.constant 0 : i32
    %c0_i32_0 = arith.constant 0 : i32
    %c0_i32_1 = arith.constant 0 : i32
    return %c0_i32, %c0_i32_0 : i32, i32
  }
  func.func @transform_3(%arg0: i32) -> (i32, i32) {
    %c0_i32 = arith.constant 0 : i32
    %c0_i32_0 = arith.constant 0 : i32
    %c0_i32_1 = arith.constant 0 : i32
    return %c0_i32, %c0_i32_0 : i32, i32
  }
  func.func @transform_4(%arg0: i32) -> i32 {
    %c0_i32 = arith.constant 0 : i32
    %c0_i32_0 = arith.constant 0 : i32
    return %c0_i32 : i32
  }
  func.func @transform_5(%arg0: i32) -> (i32, i32) {
    %c0_i32 = arith.constant 0 : i32
    %c0_i32_0 = arith.constant 0 : i32
    return %c0_i32, %arg0 : i32, i32
  }
}

</mosaic_0001>

<bundles_post_ra>
// kernel: tpu_custom_call.1
= control target key start
LH: loop header
LB: loop body
LE: loop exit
PB: predicated region body
PF: predicated region fallthrough
CT: control target
= control target key end

     0   :  { %s988_s0 = inlined_call_operand.vmem [shape: f32[4,1024], index: 0, kind: input, shape index: {}]   ;;  %s989_s1 = inlined_call_operand.vmem [shape: f32[32,4], index: 1, kind: input, shape index: {}]   ;;  %s990_s2 = inlined_call_operand.vmem [shape: f32[32,1], index: 2, kind: input, shape index: {}]   ;;  %s991_s3 = inlined_call_operand.vmem [shape: f32[32,1], index: 3, kind: input, shape index: {}]   ;;  %s992_s4 = inlined_call_operand.<no memory space> [shape: f32[1], index: 4, kind: input, shape index: {}]   ;;  %s993_s5 = inlined_call_operand.hbm [shape: f32[1,1024], index: 5, kind: output, shape index: {}]  }
   0x1   :  { %10 = sst [smem:[#allocation2]] %s992_s4 }
   0x2   :  { %11 = vsyncpa [#allocation4], 0 }
   0x3   :  { %13 = vsyncpa [#allocation4 + $0x1], 0  ;;  %s839_s20 = smov 0   ;;  %s841_s21 = smov 0  }
   0x4   :  { %s843_s22 = smov 0   ;;  %s845_s23 = smov 0  }
   0x5 LB: > { %s860_s4 = sadd.s32 4294967295, %s800_s23   ;;  %s667_s24 = sadd.s32 4294967294, %s800_s23   ;;  %s800_s23 = sphi %s845_s23, %s999_s23   ;;  %s796_s22 = sphi %s843_s22, %s998_s22   ;;  %s792_s21 = sphi %s841_s21, %s997_s21   ;;  %s788_s20 = sphi %s839_s20, %s996_s20  }
   0x6   : > { %s864_s25 = sadd.s32 1, %s800_s23   ;;  %s136_s26 = sadd.s32 1, %s796_s22 }
   0x7   : > { %s133_s27 = ssub.s32 %s800_s23, %s864_s25  ;;  %p146_p0 = scmp.ne.s32.totalorder %s796_s22, %s792_s21 }
   0x8   : > { %p134_p1 = scmp.eq.s32.totalorder %s133_s27, 0  ;;  %p147_p2 = scmp.eq.s32.totalorder %s860_s4, 1 }
   0x9   : > { %p152_p3 = scmp.ne.s32.totalorder %s792_s21, %s788_s20  ;;  %p153_p4 = scmp.eq.s32.totalorder %s667_s24, 1 }
   0xa   : > { %s875_s28 = scalar_select %p134_p1, %s796_s22, %s136_s26  }
   0xb   : > { %p877_p5 = por %p147_p2, %p146_p0  ;;  %p881_p6 = por %p153_p4, %p152_p3 }
   0xc   : > { %p670_p7 = scmp.ge.s32.totalorder %s800_s23, 1  ;;  %p192_p8 = scmp.lt.s32.totalorder %s800_s23, 3 }
   0xe   : > { %p193_p9 = pnand %p670_p7, %p192_p8 }
   0xf   : > { %s672_s6 = sshll.u32 (!%p193_p9), %s860_s4, 2  ;;  %v802_v0 = vmov (!%p193_p9), 0.0   ;;  %v233_v1 = vld [vmem:[%s990_s2] sm:$0xff] (!%p193_p9)  ;;  %v803_v2 = vmov (!%p193_p9), 0   ;;  %v235_v3 = vld [vmem:[%s990_s2 + $0x10] sm:$0xff] (!%p193_p9)  ;;  %v234_v4 = vld [vmem:[%s990_s2 + $0x8] sm:$0xff] (!%p193_p9) }
  0x10   : > { %196 = sbr.rel (%p193_p9) target bundleno = 300 (0x12c), region = 40  ;;  %p221_p10 = scmp.lt.s32.totalorder (!%p193_p9), %s672_s6, 7  ;;  %347 = vmatprep.mubr.f32.mxu0 (!%p193_p9), %v802_v0  ;;  %436 = vmatprep.mubr.f32.mxu1 (!%p193_p9), %v802_v0  ;;  %v236_v5 = vld [vmem:[%s990_s2 + $0x18] sm:$0xff] (!%p193_p9)  ;;  %vm274_vm0 = vcmask (!%p193_p9), 1043456   ;;  %v227_v10 = vld [vmem:[%s989_s1] sm:$0xff] (!%p193_p9)  ;;  %vm261_vm1 = vcmask (!%p193_p9), 31744  }
  0x11   : > { %734 = vset.pattern.permute.xlu0 (!%p193_p9), %v803_v2  ;;  %735 = vset.pattern.permute.xlu1 (!%p193_p9), %v803_v2  ;;  %v477_v11 = vld [vmem:[%s991_s3] sm:$0xff] (!%p193_p9)  ;;  %v478_v12 = vld [vmem:[%s991_s3 + $0x8] sm:$0xff] (!%p193_p9)  ;;  %v479_v14 = vld [vmem:[%s991_s3 + $0x10] sm:$0xff] (!%p193_p9)  ;;  %s217_s19 = sand.u32 (!%p193_p9), 1, %s792_s21   ;;  %s691_s26 = sshll.u32 (!%p193_p9), %s860_s4, 6 }
  0x12   : > { %239 = vperm.xlu0 (!%p193_p9), %734, %v233_v1   ;;  %249 = vperm.xlu1 (!%p193_p9), %735, %v235_v3   ;;  %v228_v13 = vld [vmem:[%s989_s1 + $0x8] sm:$0xff] (!%p193_p9)  ;;  %v480_v15 = vld [vmem:[%s991_s3 + $0x18] sm:$0xff] (!%p193_p9)  ;;  %v229_v16 = vld [vmem:[%s989_s1 + $0x10] sm:$0xff] (!%p193_p9)  ;;  %s671_s24 = sshll.u32 (!%p193_p9), %s217_s19, 2  ;;  %s946_s9 = scalar_lea.hbm (!%p193_p9), %s993_s5, %s691_s26 }
  0x13   : > { %v230_v17 = vld [vmem:[%s989_s1 + $0x18] sm:$0xff] (!%p193_p9)  ;;  %s219_s27 = scalar_lea.vmem (!%p193_p9), [#allocation3], %s671_s24  ;;  %s594_s10 = scalar_lea.sflag (!%p193_p9), [#allocation4], %s217_s19 }
  0x14   : > { %s805_s4 = smov (!%p193_p9), [#allocation3]  }
  0x15   : > { %s742_s12 = sshll.u32 (!%p193_p9), %s805_s4, 4  ;;  %s743_s12 = int_to_ptr.vmem [resolvable:$false] %s742_s12 }
  0x16   : > { %244 = vperm.xlu0 (!%p193_p9), %734, %v234_v4   ;;  %254 = vperm.xlu1 (!%p193_p9), %735, %v236_v5   ;;  %s744_s13 = scalar_lea.vmem (!%p193_p9), %s743_s12, 128 }
  0x17   : > { %s1001_s6 = smov (!%p221_p10, %s672_s6), 7 }
  0x18   : > { %s673_s15 = sshll.u32 %s1001_s6, 2  ;;  %s608_s6 = sshll.u32 %s219_s27, 4  ;;  %s948_s6 = int_to_ptr.vmem [resolvable:$true] %s608_s6 }
  0x19   : > { %s224_s18 = scalar_lea.vmem %s988_s0, %s673_s15  ;;  %s738_s11 = scalar_lea.vmem %s948_s6, 64 }
  0x1a   : > { %v231_v6 = vld [vmem:[%s224_s18] sm:$0xff]  ;;  %v232_v7 = vld [vmem:[%s224_s18 + $0x8] sm:$0xff]  ;;  %483 = vperm.xlu0 %734, %v477_v11   ;;  %488 = vperm.xlu1 %735, %v478_v12   ;;  %s553_s18 = sld [smem:[#allocation2]]  ;;  %p739_p11 = scmp.ne.s32.totalorder %s948_s6, %s738_s11 }
  0x1b   : > { %v259_v8 = vcombine.high %v231_v6, %v231_v6  ;;  %v260_v9 = vcombine.high %v232_v7, %v232_v7  ;;  %p745_p0 = scmp.lt.s32.totalorder %s948_s6, %s743_s12  ;;  %p746_p1 = scmp.lt.s32.totalorder %s744_s13, %s738_s11 }
  0x1c   : > { %p740_p12 = pnand %p739_p11, %p877_p5 }
  0x1d   : > { %674 = vmatprep.subr.msk.mxu0 %vm274_vm0, %v259_v8  ;;  %680 = vmatprep.subr.msk.mxu1 %vm274_vm0, %v260_v9  ;;  %p747_p2 = por %p746_p1, %p745_p0 }
  0x1e   : > { %675 = vmatpush1.msk.msra.mxu0 %vm274_vm0, %v231_v6  ;;  %681 = vmatpush1.msk.msra.mxu1 %vm274_vm0, %v232_v7  ;;  %p741_p13 = pneg %p740_p12 }
  0x1f   : > { %676 = vmatmul.mubr.msk.f32.vlgmr.msra.gmra.mrb[0].mxu0 %vm261_vm1, %v227_v10  ;;  %682 = vmatmul.mubr.msk.f32.vlgmr.msra.gmra.mrb[0].mxu1 %vm261_vm1, %v227_v10 }
  0x20   : > { %353 = vmatprep.mubr.f32.mxu0 %v802_v0  ;;  %442 = vmatprep.mubr.f32.mxu1 %v802_v0  ;;  %p748_p3 = pnand %p747_p2, %p741_p13 }
  0x21   : > { %493 = vperm.xlu0 %734, %v479_v14   ;;  %498 = vperm.xlu1 %735, %v480_v15  }
  0x23   : > { %677 = vmatmul.mubr.msk.f32.gmra.mrb[2].mxu0 %vm261_vm1, %v228_v13  ;;  %683 = vmatmul.mubr.msk.f32.gmra.mrb[2].mxu1 %vm261_vm1, %v228_v13 }
  0x24   : > { %359 = vmatprep.mubr.f32.mxu0 %v802_v0  ;;  %448 = vmatprep.mubr.f32.mxu1 %v802_v0 }
  0x27   : > { %678 = vmatmul.mubr.msk.f32.gmra.mrb[4].mxu0 %vm261_vm1, %v229_v16  ;;  %684 = vmatmul.mubr.msk.f32.gmra.mrb[4].mxu1 %vm261_vm1, %v229_v16 }
  0x28   : > { %365 = vmatprep.mubr.f32.mxu0 %v802_v0  ;;  %454 = vmatprep.mubr.f32.mxu1 %v802_v0 }
  0x2b   : > { %679 = vmatmul.mubr.msk.f32.gmra.mrb[6].mxu0 %vm261_vm1, %v230_v17  ;;  %685 = vmatmul.mubr.msk.f32.gmra.mrb[6].mxu1 %vm261_vm1, %v230_v17 }
  0x91   : > { %v240_v18 = vpop.permute.xlu0 %239  ;;  %v250_v19 = vpop.permute.xlu1 %249 }
  0x95   : > { %v245_v20 = vpop.permute.xlu0 %244  ;;  %v935_v21 = vpop.permute.xlu1 %254 }
  0x99   : > { %v484_v30 = vpop.permute.xlu0 %483  ;;  %v489_v45 = vpop.permute.xlu1 %488 }
  0xa0   : > { %v494_v0 = vpop.permute.xlu0 %493 }
  0xf2   : > { %v349_v22 = vpop.f32.mrb[0].mxu0  ;;  %v438_v23 = vpop.f32.mrb[0].mxu1 }
  0xf3   : > { %v350_v24 = vadd.f32 %v349_v22, %v240_v18  ;;  %v439_v25 = vadd.f32 %v438_v23, %v240_v18  ;;  %v351_v26 = vpop.f32.mrb[1].mxu0  ;;  %v440_v27 = vpop.f32.mrb[1].mxu1 }
  0xf4   : > { %v352_v28 = vadd.f32 %v351_v26, %v240_v18  ;;  %v441_v29 = vadd.f32 %v440_v27, %v240_v18  ;;  %v499_v26 = vpop.permute.xlu1 %498 }
  0xf5   : > { %v461_v31 = vmax.f32 %v350_v24, 0.0  ;;  %v463_v32 = vmax.f32 %v439_v25, 0.0 }
  0xf6   : > { %v462_v33 = vmax.f32 %v352_v28, 0.0  ;;  %v464_v34 = vmax.f32 %v441_v29, 0.0  ;;  %v355_v35 = vpop.f32.mrb[2].mxu0  ;;  %v444_v36 = vpop.f32.mrb[2].mxu1 }
  0xf7   : > { %v356_v37 = vadd.f32 %v355_v35, %v245_v20  ;;  %v445_v38 = vadd.f32 %v444_v36, %v245_v20  ;;  %v357_v39 = vpop.f32.mrb[3].mxu0  ;;  %v446_v40 = vpop.f32.mrb[3].mxu1  ;;  %v501_v43 = vmul.f32 %v484_v30, %v461_v31  ;;  %v503_v44 = vmul.f32 %v484_v30, %v463_v32 }
  0xf8   : > { %v358_v41 = vadd.f32 %v357_v39, %v245_v20  ;;  %v447_v42 = vadd.f32 %v446_v40, %v245_v20  ;;  %v502_v48 = vmul.f32 %v484_v30, %v462_v33  ;;  %v504_v49 = vmul.f32 %v484_v30, %v464_v34 }
  0xf9   : > { %v465_v46 = vmax.f32 %v356_v37, 0.0  ;;  %v467_v47 = vmax.f32 %v445_v38, 0.0 }
  0xfa   : > { %v466_v50 = vmax.f32 %v358_v41, 0.0  ;;  %v468_v51 = vmax.f32 %v447_v42, 0.0  ;;  %v361_v52 = vpop.f32.mrb[4].mxu0  ;;  %v450_v53 = vpop.f32.mrb[4].mxu1 }
  0xfb   : > { %v505_v54 = vmul.f32 %v489_v45, %v465_v46  ;;  %v507_v55 = vmul.f32 %v489_v45, %v467_v47  ;;  %v362_v56 = vadd.f32 %v361_v52, %v250_v19  ;;  %v451_v57 = vadd.f32 %v450_v53, %v250_v19  ;;  %v363_v58 = vpop.f32.mrb[5].mxu0  ;;  %v452_v59 = vpop.f32.mrb[5].mxu1 }
  0xfc   : > { %v506_v60 = vmul.f32 %v489_v45, %v466_v50  ;;  %v508_v61 = vmul.f32 %v489_v45, %v468_v51  ;;  %v364_v62 = vadd.f32 %v363_v58, %v250_v19  ;;  %v453_v63 = vadd.f32 %v452_v59, %v250_v19 }
  0xfd   : > { %v517_v1 = vadd.f32 %v505_v54, %v501_v43  ;;  %v535_v2 = vadd.f32 %v507_v55, %v503_v44  ;;  %v469_v3 = vmax.f32 %v362_v56, 0.0  ;;  %v471_v4 = vmax.f32 %v451_v57, 0.0 }
  0xfe   : > { %v526_v5 = vadd.f32 %v506_v60, %v502_v48  ;;  %v544_v6 = vadd.f32 %v508_v61, %v504_v49  ;;  %v470_v7 = vmax.f32 %v364_v62, 0.0  ;;  %v472_v8 = vmax.f32 %v453_v63, 0.0  ;;  %v367_v9 = vpop.f32.mrb[6].mxu0  ;;  %v456_v10 = vpop.f32.mrb[6].mxu1 }
  0xff   : > { %v509_v11 = vmul.f32 %v494_v0, %v469_v3  ;;  %v511_v12 = vmul.f32 %v494_v0, %v471_v4  ;;  %v368_v13 = vadd.f32 %v367_v9, %v935_v21  ;;  %v457_v14 = vadd.f32 %v456_v10, %v935_v21  ;;  %v369_v15 = vpop.f32.mrb[7].mxu0  ;;  %v458_v16 = vpop.f32.mrb[7].mxu1 }
 0x100   : > { %v510_v17 = vmul.f32 %v494_v0, %v470_v7  ;;  %v512_v18 = vmul.f32 %v494_v0, %v472_v8  ;;  %v370_v19 = vadd.f32 %v369_v15, %v935_v21  ;;  %v459_v20 = vadd.f32 %v458_v16, %v935_v21 }
 0x101   : > { %v518_v22 = vadd.f32 %v517_v1, %v509_v11  ;;  %v536_v23 = vadd.f32 %v535_v2, %v511_v12  ;;  %v473_v24 = vmax.f32 %v368_v13, 0.0  ;;  %v475_v25 = vmax.f32 %v457_v14, 0.0 }
 0x102   : > { %v527_v27 = vadd.f32 %v526_v5, %v510_v17  ;;  %v545_v28 = vadd.f32 %v544_v6, %v512_v18  ;;  %v474_v29 = vmax.f32 %v370_v19, 0.0  ;;  %v476_v30 = vmax.f32 %v459_v20, 0.0 }
 0x103   : > { %v513_v31 = vmul.f32 %v499_v26, %v473_v24  ;;  %v515_v32 = vmul.f32 %v499_v26, %v475_v25  ;;  %v804_v50 = vmov 1966171168   ;;  %v568_v52 = vlaneseq }
 0x104   : > { %v514_v33 = vmul.f32 %v499_v26, %v474_v29  ;;  %v516_v34 = vmul.f32 %v499_v26, %v476_v30  ;;  %v566_v51 = vunpack.c.l.s4 %v804_v50  ;;  %v554_v58 = vstv %s553_s18 }
 0x105   : > { %v519_v35 = vadd.f32 %v518_v22, %v513_v31  ;;  %v537_v36 = vadd.f32 %v536_v23, %v515_v32  ;;  %v569_v63 = vshrl.u32 %v568_v52, 7  ;;  %vm590_vm2 = vcmp.lt.s32.totalorder %v568_v52, 512 }
 0x106   : > { %v528_v37 = vadd.f32 %v527_v27, %v514_v33  ;;  %v546_v38 = vadd.f32 %v545_v28, %v516_v34  ;;  %v567_v62 = vunpack.c.0.s8 %v566_v51 }
 0x107   : > { %v520_v39 = vrot.slane %v519_v35, 4  ;;  %v538_v21 = vrot.slane %v537_v36, 4 }
 0x108   : > { %v529_v40 = vrot.slane %v528_v37, 4  ;;  %v547_v41 = vrot.slane %v546_v38, 4  ;;  %v570_v8 = vsub.s32 %v567_v62, %v569_v63 }
 0x109   : > { %v521_v42 = vadd.f32 %v520_v39, %v519_v35  ;;  %v539_v43 = vadd.f32 %v538_v21, %v537_v36 }
 0x10a   : > { %v530_v44 = vadd.f32 %v529_v40, %v528_v37  ;;  %v548_v45 = vadd.f32 %v547_v41, %v546_v38 }
 0x10b   : > { %v522_v46 = vrot.slane %v521_v42, 2  ;;  %v540_v47 = vrot.slane %v539_v43, 2 }
 0x10c   : > { %v531_v48 = vrot.slane %v530_v44, 2  ;;  %v549_v49 = vrot.slane %v548_v45, 2 }
 0x10d   : > { %v523_v53 = vadd.f32 %v522_v46, %v521_v42  ;;  %v541_v54 = vadd.f32 %v540_v47, %v539_v43 }
 0x10e   : > { %v532_v55 = vadd.f32 %v531_v48, %v530_v44  ;;  %v550_v56 = vadd.f32 %v549_v49, %v548_v45 }
 0x10f   : > { %v524_v57 = vrot.slane %v523_v53, 1  ;;  %v542_v59 = vrot.slane %v541_v54, 1 }
 0x110   : > { %v533_v60 = vrot.slane %v532_v55, 1  ;;  %v551_v61 = vrot.slane %v550_v56, 1 }
 0x111   : > { %v525_v0 = vadd.f32 %v524_v57, %v523_v53  ;;  %v543_v1 = vadd.f32 %v542_v59, %v541_v54 }
 0x112   : > { %v534_v2 = vadd.f32 %v533_v60, %v532_v55  ;;  %v552_v3 = vadd.f32 %v551_v61, %v550_v56 }
 0x113   : > { %v555_v4 = vadd.f32 %v554_v58, %v525_v0  ;;  %v557_v5 = vadd.f32 %v554_v58, %v543_v1 }
 0x114   : > { %v556_v6 = vadd.f32 %v554_v58, %v534_v2  ;;  %v558_v7 = vadd.f32 %v554_v58, %v552_v3 }
 0x116   : > { %v563_v9 = vcombine.low %v555_v4, %v556_v6  ;;  %v564_v10 = vcombine.low %v557_v5, %v558_v7 }
 0x118   : > { %v571_v11 = vrot.slane %v563_v9, %v570_v8  ;;  %v578_v12 = vrot.slane %v564_v10, %v570_v8 }
 0x11a   : > { %v579_v13 = vcombine.low %v571_v11, %v578_v12 }
 0x11c   : > { %v586_v14 = vrot.slane %v579_v13, %v570_v8 }
 0x11e   : > { %592 = vst.msk [vmem:[%s219_s27] sm:$0xf] %vm590_vm2, %v586_v14 }
 0x11f   : > { %751 = shalt.err (!%p748_p3)
}
 0x120   : > { %s752_s14 = scalar_lea.hbm %s946_s9, 64  ;;  %s756_s17 = scalar_lea.hbm %s993_s5, 128 }
 0x121   : > { %p753_p4 = scmp.ne.s32.totalorder %s946_s9, %s752_s14  ;;  %p757_p9 = scmp.lt.u32.totalorder %s946_s9, %s993_s5 }
 0x122   : > { %p758_p10 = scmp.lt.u32.totalorder %s756_s17, %s752_s14  ;;  %p760_p12 = scmp.lt.u32.totalorder %s752_s14, %s946_s9 }
 0x123   : > { %p754_p7 = pnand %p753_p4, %p877_p5 }
 0x124   : > { %p759_p11 = por %p758_p10, %p757_p9 }
 0x125   : > { %p755_p8 = pneg %p754_p7 }
 0x126   : > { %p761_p13 = por %p760_p12, %p759_p11 }
 0x128   : > { %p762_p0 = pnand %p761_p13, %p755_p8 }
 0x12a   : > { %765 = shalt.err (!%p762_p0)
}
 0x12b   : > { %692 = dma.vmem_to_hbm [thread:$0]  (%p877_p5), %s948_s6, 64, %s946_s9, %s594_s10  }
 0x12c PF: > { %p698_p1 = scmp.ge.s32.totalorder %s800_s23, 2  ;;  %s620_s24 = sand.u32 1, %s788_s20  }
 0x12d   : > { %s621_s26 = scalar_lea.sflag [#allocation4], %s620_s24 }
 0x12e   : > { %p695_p2 = pnand %p698_p1, %p881_p6 }
 0x130   : > { %783 = dma.done.wait (!%p695_p2), %s621_s26, 64  }
 0x131   : > { %785 = vsyncadd (!%p695_p2), %s621_s26, 4294967232  ;;  %p16_p3 = scmp.ge.s32.totalorder %s864_s25, 4   ;;  %s996_s20 = smov %s792_s21 }
 0x132   : > { %s997_s21 = smov %s796_s22  ;;  %s998_s22 = smov %s875_s28 }
 0x133   : > { %s999_s23 = smov %s864_s25  ;;  %18 = sbr.rel (!%p16_p3) target bundleno = 5 (0x5), region = 75 }
 0x13a   :  { %626 = vsyncpa [#allocation4], 1 }
 0x13b   :  { %628 = vsyncpa [#allocation4 + $0x1], 1 }

</bundles_post_ra>
